<compile_context>
chip_gen: v7x
topology: tpu7x:2x2x1
jax: 0.10.0
libtpu: 0.0.40
codegen_flags: <defaults>
</compile_context>

<pallas_src>
from functools import partial

import jax
import jax.numpy as jnp
from jax.experimental import pallas as pl
from jax.experimental.pallas import tpu as pltpu


# --------------------------------------------------------------------------- #
# Kernel
# --------------------------------------------------------------------------- #
def fsp_kernel(guide_ref, main_ref, w1g_ref, w1m_ref, b1_ref, w2_ref, b2_ref,
               out_ref):
    g = guide_ref[...]            # (bt, C, HW), streamed dtype
    m = main_ref[...]             # (bt, C, HW), streamed dtype

    # Global average pool over the spatial axis (== AdaptiveAvgPool2d(1)).
    # Sum with an f32 accumulator (no explicit up-cast copy of the slab).
    inv_hw = jnp.float32(1.0 / g.shape[-1])
    pg = jnp.sum(g, axis=-1, dtype=jnp.float32) * inv_hw    # (bt, C) f32
    pm = jnp.sum(m, axis=-1, dtype=jnp.float32) * inv_hw    # (bt, C) f32

    # fc: Linear(2C -> hidden) + ReLU, with the channel concat folded into two
    # half-matmuls.  K/N are tiny, so this is negligible next to the streaming.
    h = (jnp.dot(pg, w1g_ref[...], preferred_element_type=jnp.float32)
         + jnp.dot(pm, w1m_ref[...], preferred_element_type=jnp.float32)
         + b1_ref[...])                                      # (bt, hidden)
    h = jnp.maximum(h, 0.0)

    # Linear(hidden -> C) + Sigmoid (sigmoid goes to the EUP slot -> ~free).
    s = jnp.dot(h, w2_ref[...], preferred_element_type=jnp.float32) + b2_ref[...]
    s = jax.nn.sigmoid(s)                                    # (bt, C) f32

    # Gate: out = main + s * guide, broadcast over the lane-dense spatial axis.
    # s is kept in f32 so the FMA runs in f32 (via promotion) and rounds once at
    # the store.  Written exactly once per block -> safe to alias with `main`.
    out_ref[...] = (m + s[:, :, None] * g).astype(out_ref.dtype)


# --------------------------------------------------------------------------- #
# Wrapper / tiling policy
# --------------------------------------------------------------------------- #
def _round_up(x, m):
    return (x + m - 1) // m * m


def _sublane_pack(itemsize):
    # Sub-32-bit dtypes pack along sublanes: 8 rows for 4B, 16 for 2B, 32 for 1B.
    return 8 * max(1, 4 // max(1, itemsize))


def _vmem_capacity_bytes():
    """Physical per-core VMEM (trace-time query), with a conservative fallback."""
    try:
        info = pltpu.get_tpu_info()
        for name in ("vmem_capacity_bytes", "vmem_bytes", "vmem_size_bytes"):
            v = getattr(info, name, None)
            if v:
                return int(v)
    except Exception:
        pass
    return 64 * 1024 * 1024        # v7x per-core VMEM: safe lower bound


@partial(jax.jit,
         static_argnames=("batch_block", "target_block_bytes"),
         donate_argnames=("main",))
def fsp_forward(guide, main, w1, b1, w2, b2, *, batch_block=None,
                target_block_bytes=None):
    """guide, main: (B, C, H, W).  w1: (2C, hidden), b1: (hidden,),
    w2: (hidden, C), b2: (C,).

    `main` is donated: its HBM buffer is reused for the output (the kernel
    aliases output<-main), so callers must not reuse the array they pass in.
    """
    B, C, H, W = guide.shape
    HW = H * W
    hidden = w1.shape[1]
    assert w1.shape[0] == 2 * C, "w1 must be (2*C, hidden) = transposed torch weight"
    dtype = guide.dtype
    itemsize = jnp.dtype(dtype).itemsize

    # Streamed views: (B, C, HW).  Spatial axis stays the (lane-dense) last dim.
    g3 = guide.reshape(B, C, HW)
    m3 = main.reshape(B, C, HW)

    # Fold the concat: guide half / main half of the first Linear (f32 weights).
    w1g = w1[:C, :].astype(jnp.float32)
    w1m = w1[C:, :].astype(jnp.float32)
    b1_2d = b1.reshape(1, hidden).astype(jnp.float32)
    w2f = w2.astype(jnp.float32)
    b2_2d = b2.reshape(1, C).astype(jnp.float32)

    # ---- Padding-aware VMEM accounting -----------------------------------
    pad_c = _round_up(C, _sublane_pack(itemsize))
    pad_hw = _round_up(HW, 128)
    per_sample = pad_c * pad_hw * itemsize            # padded bytes of one (C, HW)

    def _pad2d_f32(r, c):
        return _round_up(r, 8) * _round_up(c, 128) * 4

    weight_bytes = (2 * _pad2d_f32(C, hidden) + _pad2d_f32(1, hidden)
                    + _pad2d_f32(hidden, C) + _pad2d_f32(1, C))

    vmem_cap = _vmem_capacity_bytes()                  # physical (v7x 64Mi, v5e/v6e 128Mi)
    vmem_ceiling = int(vmem_cap * 0.85)                # leave Mosaic scratch headroom
    reserve = 2 * weight_bytes + (2 << 20)             # dbl-buffered weights + slack

    # Per-slab byte budget.  guide/main/out slabs are each double-buffered -> 6x.
    if target_block_bytes is None:
        slab_cap = (16 << 20) if vmem_cap >= (96 << 20) else (8 << 20)
        slab_budget = max(1 << 20, min((vmem_ceiling - reserve) // 6, slab_cap))
    else:
        slab_budget = int(target_block_bytes)

    # ---- Batch-tile selection (no divisibility requirement) --------------
    if batch_block is None:
        bt = max(1, slab_budget // max(per_sample, 1))
    else:
        bt = int(batch_block)
    bt = max(1, min(bt, B))
    n_blocks = pl.cdiv(B, bt)      # ragged last block: padded read / discarded write

    vmem_need = 6 * bt * per_sample + reserve
    vmem_limit = max(vmem_need, 32 << 20)
    if vmem_need <= vmem_ceiling:
        vmem_limit = min(vmem_limit, vmem_ceiling)
    vmem_limit = int(min(vmem_limit, vmem_cap))
    # TODO(synk): if a single sample (C*HW) exceeds the slab budget (very large
    # feature maps, tightest on v7x's 64 MiB VMEM), add an 'arbitrary' HW grid
    # axis with pooled partial sums in scratch (or split pool + gate passes).

    data_spec = pl.BlockSpec((bt, C, HW), lambda i: (i, 0, 0))
    # Constant block index -> weights stay resident in VMEM across grid steps.
    resident = lambda shape: pl.BlockSpec(shape, lambda i: (0, 0))

    out3 = pl.pallas_call(
        fsp_kernel,
        out_shape=jax.ShapeDtypeStruct((B, C, HW), dtype),
        grid=(n_blocks,),
        in_specs=[
            data_spec,                        # guide
            data_spec,                        # main (aliased with output)
            resident((C, hidden)),            # w1 guide half
            resident((C, hidden)),            # w1 main half
            resident((1, hidden)),            # b1
            resident((hidden, C)),            # w2
            resident((1, C)),                 # b2
        ],
        out_specs=data_spec,
        input_output_aliases={1: 0},          # out buffer reuses `main`'s buffer
        compiler_params=pltpu.CompilerParams(
            dimension_semantics=("parallel",),
            vmem_limit_bytes=vmem_limit,
        ),
    )(g3, m3, w1g, w1m, b1_2d, w2f, b2_2d)

    return out3.reshape(B, C, H, W)


# --------------------------------------------------------------------------- #
# Pure-JAX reference
# --------------------------------------------------------------------------- #
def fsp_reference(guide, main, w1, b1, w2, b2):
    combined = jnp.concatenate([guide, main], axis=1)          # (B, 2C, H, W)
    y = jnp.mean(combined.astype(jnp.float32), axis=(2, 3))    # (B, 2C)
    h = jnp.maximum(y @ w1 + b1, 0.0)
    s = jax.nn.sigmoid(h @ w2 + b2)                            # (B, C)
    return main + s[:, :, None, None] * guide


if __name__ == "__main__":
    import warnings
    # Donation-related notices (e.g. "donated buffers were not usable") are
    # harmless; silence them so the script output stays clean.
    warnings.filterwarnings("ignore", message=".*donat.*")

    # Small shapes consistent with the module: in_channels = out_channels = 4,
    # reduction = 2 -> hidden = out_channels // reduction = 2.
    B, C, H, W = 4, 4, 16, 16
    reduction = 2
    hidden = C // reduction

    key = jax.random.PRNGKey(0)
    k_g, k_m, k_w1, k_b1, k_w2, k_b2 = jax.random.split(key, 6)

    guide = jax.random.normal(k_g, (B, C, H, W), dtype=jnp.float32)
    main = jax.random.normal(k_m, (B, C, H, W), dtype=jnp.float32)

    # Parameters in (in, out) layout (transpose of torch Linear.weight),
    # guide channels first to match the concat order.
    w1 = jax.random.normal(k_w1, (2 * C, hidden), dtype=jnp.float32) * 0.1
    b1 = jax.random.normal(k_b1, (hidden,), dtype=jnp.float32) * 0.1
    w2 = jax.random.normal(k_w2, (hidden, C), dtype=jnp.float32) * 0.1
    b2 = jax.random.normal(k_b2, (C,), dtype=jnp.float32) * 0.1

    ref = fsp_reference(guide, main, w1, b1, w2, b2)
    jax.block_until_ready(ref)

    # `main` is donated by fsp_forward, so pass fresh copies to each call and
    # keep the original around for the reference comparison.

    # 1) Default tiling: the whole batch fits one slab -> grid=(1,).
    out = fsp_forward(guide, jnp.copy(main), w1, b1, w2, b2)
    jax.block_until_ready(out)
    assert out.shape == (B, C, H, W)
    assert jnp.allclose(out, ref, atol=1e-5, rtol=1e-5), "mismatch vs reference"

    # 2) Forced multi-step grid (bt=2 -> grid=(2,)): exercises double-buffered
    #    streaming, resident weights and the aliased in-place output on hardware.
    out2 = fsp_forward(guide, jnp.copy(main), w1, b1, w2, b2, batch_block=2)
    jax.block_until_ready(out2)
    assert jnp.allclose(out2, ref, atol=1e-5, rtol=1e-5), "mismatch vs reference (tiled)"

    print("KERNEL_OK")
</pallas_src>

<mosaic_0001>
module attributes {stable_mosaic.version = 11 : i64} {
  func.func @fsp_kernel(%arg0: i32, %arg1: memref<4x4x256xf32, #tpu.memory_space<vmem>>, %arg2: memref<4x4x256xf32, #tpu.memory_space<vmem>>, %arg3: memref<4x2xf32, #tpu.memory_space<vmem>>, %arg4: memref<4x2xf32, #tpu.memory_space<vmem>>, %arg5: memref<1x2xf32, #tpu.memory_space<vmem>>, %arg6: memref<2x4xf32, #tpu.memory_space<vmem>>, %arg7: memref<1x4xf32, #tpu.memory_space<vmem>>, %arg8: memref<4x4x256xf32, #tpu.memory_space<vmem>>) attributes {dimension_semantics = [#tpu.dimension_semantics<parallel>], iteration_bounds = array<i64: 1>, scalar_prefetch = 0 : i64, scratch_operands = 0 : i64, tpu.core_type = #tpu.core_type<tc>, window_params = [{transform_indices = @transform_0, window_bounds = array<i64: 4, 4, 256>}, {transform_indices = @transform_1, window_bounds = array<i64: 4, 4, 256>}, {pipeline_mode = #tpu.pipeline_mode<synchronous>, transform_indices = @transform_2, window_bounds = array<i64: 4, 2>}, {pipeline_mode = #tpu.pipeline_mode<synchronous>, transform_indices = @transform_3, window_bounds = array<i64: 4, 2>}, {pipeline_mode = #tpu.pipeline_mode<synchronous>, transform_indices = @transform_4, window_bounds = array<i64: 1, 2>}, {pipeline_mode = #tpu.pipeline_mode<synchronous>, transform_indices = @transform_5, window_bounds = array<i64: 2, 4>}, {pipeline_mode = #tpu.pipeline_mode<synchronous>, transform_indices = @transform_6, window_bounds = array<i64: 1, 4>}, {transform_indices = @transform_7, window_bounds = array<i64: 4, 4, 256>}]} {
    %c0 = arith.constant 0 : index
    %c0_0 = arith.constant 0 : index
    %c0_1 = arith.constant 0 : index
    %0 = vector.load %arg1[%c0, %c0_0, %c0_1] : memref<4x4x256xf32, #tpu.memory_space<vmem>>, vector<4x4x256xf32>
    %c0_2 = arith.constant 0 : index
    %c0_3 = arith.constant 0 : index
    %c0_4 = arith.constant 0 : index
    %1 = vector.load %arg2[%c0_2, %c0_3, %c0_4] : memref<4x4x256xf32, #tpu.memory_space<vmem>>, vector<4x4x256xf32>
    %cst = arith.constant dense<0.000000e+00> : vector<4x4xf32>
    %2 = vector.multi_reduction <add>, %0, %cst [2] : vector<4x4x256xf32> to vector<4x4xf32>
    %cst_5 = arith.constant 3.906250e-03 : f32
    %3 = vector.broadcast %cst_5 : f32 to vector<4x4xf32>
    %4 = arith.mulf %2, %3 : vector<4x4xf32>
    %cst_6 = arith.constant dense<0.000000e+00> : vector<4x4xf32>
    %5 = vector.multi_reduction <add>, %1, %cst_6 [2] : vector<4x4x256xf32> to vector<4x4xf32>
    %cst_7 = arith.constant 3.906250e-03 : f32
    %6 = vector.broadcast %cst_7 : f32 to vector<4x4xf32>
    %7 = arith.mulf %5, %6 : vector<4x4xf32>
    %c0_8 = arith.constant 0 : index
    %c0_9 = arith.constant 0 : index
    %8 = vector.load %arg3[%c0_8, %c0_9] : memref<4x2xf32, #tpu.memory_space<vmem>>, vector<4x2xf32>
    %cst_10 = arith.constant dense<0.000000e+00> : vector<4x2xf32>
    %9 = tpu.matmul %4, %8, %cst_10 {dimension_numbers = #tpu.dot_dimension_numbers<[1], [0], [0], [1], [0, 0, 1, 1], [], []>} : vector<4x4xf32>, vector<4x2xf32>, vector<4x2xf32> -> vector<4x2xf32>
    %c0_11 = arith.constant 0 : index
    %c0_12 = arith.constant 0 : index
    %10 = vector.load %arg4[%c0_11, %c0_12] : memref<4x2xf32, #tpu.memory_space<vmem>>, vector<4x2xf32>
    %cst_13 = arith.constant dense<0.000000e+00> : vector<4x2xf32>
    %11 = tpu.matmul %7, %10, %cst_13 {dimension_numbers = #tpu.dot_dimension_numbers<[1], [0], [0], [1], [0, 0, 1, 1], [], []>} : vector<4x4xf32>, vector<4x2xf32>, vector<4x2xf32> -> vector<4x2xf32>
    %12 = arith.addf %9, %11 : vector<4x2xf32>
    %c0_14 = arith.constant 0 : index
    %c0_15 = arith.constant 0 : index
    %13 = vector.load %arg5[%c0_14, %c0_15] : memref<1x2xf32, #tpu.memory_space<vmem>>, vector<1x2xf32>
    %14 = vector.broadcast %13 : vector<1x2xf32> to vector<4x2xf32>
    %15 = arith.addf %12, %14 : vector<4x2xf32>
    %cst_16 = arith.constant 0.000000e+00 : f32
    %16 = vector.broadcast %cst_16 : f32 to vector<4x2xf32>
    %17 = arith.maximumf %15, %16 : vector<4x2xf32>
    %c0_17 = arith.constant 0 : index
    %c0_18 = arith.constant 0 : index
    %18 = vector.load %arg6[%c0_17, %c0_18] : memref<2x4xf32, #tpu.memory_space<vmem>>, vector<2x4xf32>
    %cst_19 = arith.constant dense<0.000000e+00> : vector<4x4xf32>
    %19 = tpu.matmul %17, %18, %cst_19 {dimension_numbers = #tpu.dot_dimension_numbers<[1], [0], [0], [1], [0, 0, 1, 1], [], []>} : vector<4x2xf32>, vector<2x4xf32>, vector<4x4xf32> -> vector<4x4xf32>
    %c0_20 = arith.constant 0 : index
    %c0_21 = arith.constant 0 : index
    %20 = vector.load %arg7[%c0_20, %c0_21] : memref<1x4xf32, #tpu.memory_space<vmem>>, vector<1x4xf32>
    %21 = vector.broadcast %20 : vector<1x4xf32> to vector<4x4xf32>
    %22 = arith.addf %19, %21 : vector<4x4xf32>
    %23 = arith.negf %22 : vector<4x4xf32>
    %24 = math.exp %23 : vector<4x4xf32>
    %cst_22 = arith.constant 1.000000e+00 : f32
    %25 = vector.broadcast %cst_22 : f32 to vector<4x4xf32>
    %26 = arith.addf %25, %24 : vector<4x4xf32>
    %27 = arith.divf %25, %26 : vector<4x4xf32>
    %28 = vector.shape_cast %27 : vector<4x4xf32> to vector<4x4x1xf32>
    %29 = vector.broadcast %28 : vector<4x4x1xf32> to vector<4x4x256xf32>
    %30 = arith.mulf %29, %0 : vector<4x4x256xf32>
    %31 = arith.addf %1, %30 : vector<4x4x256xf32>
    %c0_23 = arith.constant 0 : index
    %c0_24 = arith.constant 0 : index
    %c0_25 = arith.constant 0 : index
    %32 = vector.load %arg8[%c0_23, %c0_24, %c0_25] : memref<4x4x256xf32, #tpu.memory_space<vmem>>, vector<4x4x256xf32>
    tpu.vector_store %arg8[%c0_23, %c0_24, %c0_25], %31 {strides = array<i32>} : memref<4x4x256xf32, #tpu.memory_space<vmem>>, vector<4x4x256xf32>,
    return
  }
  func.func @transform_0(%arg0: i32) -> (i32, i32, i32) {
    %c0_i32 = arith.constant 0 : i32
    %c0_i32_0 = arith.constant 0 : i32
    %c0_i32_1 = arith.constant 0 : i32
    return %arg0, %c0_i32, %c0_i32_0 : i32, i32, i32
  }
  func.func @transform_1(%arg0: i32) -> (i32, i32, i32) {
    %c0_i32 = arith.constant 0 : i32
    %c0_i32_0 = arith.constant 0 : i32
    %c0_i32_1 = arith.constant 0 : i32
    return %arg0, %c0_i32, %c0_i32_0 : i32, i32, i32
  }
  func.func @transform_2(%arg0: i32) -> (i32, i32) {
    %c0_i32 = arith.constant 0 : i32
    %c0_i32_0 = arith.constant 0 : i32
    %c0_i32_1 = arith.constant 0 : i32
    return %c0_i32, %c0_i32_0 : i32, i32
  }
  func.func @transform_3(%arg0: i32) -> (i32, i32) {
    %c0_i32 = arith.constant 0 : i32
    %c0_i32_0 = arith.constant 0 : i32
    %c0_i32_1 = arith.constant 0 : i32
    return %c0_i32, %c0_i32_0 : i32, i32
  }
  func.func @transform_4(%arg0: i32) -> (i32, i32) {
    %c0_i32 = arith.constant 0 : i32
    %c0_i32_0 = arith.constant 0 : i32
    %c0_i32_1 = arith.constant 0 : i32
    return %c0_i32, %c0_i32_0 : i32, i32
  }
  func.func @transform_5(%arg0: i32) -> (i32, i32) {
    %c0_i32 = arith.constant 0 : i32
    %c0_i32_0 = arith.constant 0 : i32
    %c0_i32_1 = arith.constant 0 : i32
    return %c0_i32, %c0_i32_0 : i32, i32
  }
  func.func @transform_6(%arg0: i32) -> (i32, i32) {
    %c0_i32 = arith.constant 0 : i32
    %c0_i32_0 = arith.constant 0 : i32
    %c0_i32_1 = arith.constant 0 : i32
    return %c0_i32, %c0_i32_0 : i32, i32
  }
  func.func @transform_7(%arg0: i32) -> (i32, i32, i32) {
    %c0_i32 = arith.constant 0 : i32
    %c0_i32_0 = arith.constant 0 : i32
    %c0_i32_1 = arith.constant 0 : i32
    return %arg0, %c0_i32, %c0_i32_0 : i32, i32, i32
  }
}

</mosaic_0001>

<bundles_post_ra>
// kernel: fsp_forward.1
= control target key start
LH: loop header
LB: loop body
LE: loop exit
PB: predicated region body
PF: predicated region fallthrough
CT: control target
= control target key end

     0   :  { %vm46_vm0 = vcmask 1043456   ;;  %v520_v40 = vmov 0.0   ;;  %vm521_vm1 = vmmov 0   ;;  %v113_v43 = vlaneseq  ;;  %s705_s1 = inlined_call_operand.vmem [shape: f32[4,4,256], index: 1, kind: input, shape index: {}, may-alias: {1,7}]   ;;  %s706_s0 = inlined_call_operand.vmem [shape: f32[4,4,256], index: 0, kind: input, shape index: {}]   ;;  %s707_s3 = inlined_call_operand.vmem [shape: f32[4,2], index: 3, kind: input, shape index: {}]   ;;  %s708_s2 = inlined_call_operand.vmem [shape: f32[4,2], index: 2, kind: input, shape index: {}]   ;;  %s709_s5 = inlined_call_operand.vmem [shape: f32[2,4], index: 5, kind: input, shape index: {}]   ;;  %s710_s4 = inlined_call_operand.vmem [shape: f32[1,2], index: 4, kind: input, shape index: {}]   ;;  %s711_s6 = inlined_call_operand.vmem [shape: f32[1,4], index: 6, kind: input, shape index: {}]   ;;  %s712_s7 = inlined_call_operand.vmem [shape: f32[4,4,256], index: 7, kind: output, shape index: {}, may-alias: {1,7}]  }
   0x1   :  { %v565_v0 = vld [vmem:[%s705_s1] sm:$0xff]  ;;  %v575_v2 = vld [vmem:[%s705_s1 + $0x8] sm:$0xff]  ;;  %v595_v8 = vld [vmem:[%s705_s1 + $0x10] sm:$0xff]  ;;  %491 = vmatprep.subr.mxu0 %v520_v40  ;;  %496 = vmatprep.subr.mxu1 %v520_v40  ;;  %vm131_vm2 = vcmask 1041409   ;;  %vm133_vm3 = vcmask 1042434   ;;  %vm135_vm4 = vcmask 1043459  }
   0x2   :  { %v570_v1 = vld [vmem:[%s706_s0] sm:$0xff]  ;;  %v75_v3 = vcombine.high %v565_v0, %v565_v0  ;;  %v83_v4 = vsel %vm46_vm0, %v565_v0, 0.0  ;;  %v590_v7 = vld [vmem:[%s706_s0 + $0x8] sm:$0xff]  ;;  %v76_v9 = vcombine.high %v575_v2, %v575_v2  ;;  %v88_v10 = vsel %vm46_vm0, %v575_v2, 0.0  ;;  %v608_v12 = vld [vmem:[%s706_s0 + $0x10] sm:$0xff]  ;;  %493 = vmatprep.mubr.msk.f32.mxu0 %vm521_vm1, %v520_v40  ;;  %498 = vmatprep.mubr.msk.f32.mxu1 %vm521_vm1, %v520_v40 }
   0x3   :  { %v583_v5 = vcombine.high %v570_v1, %v570_v1  ;;  %v47_v6 = vsel %vm46_vm0, %v570_v1, 0.0  ;;  %v603_v11 = vcombine.high %v590_v7, %v590_v7  ;;  %v52_v15 = vsel %vm46_vm0, %v590_v7, 0.0  ;;  %v623_v21 = vld [vmem:[%s705_s1 + $0x18] sm:$0xff]  ;;  %v108_v41 = vld [vmem:[%s707_s3] sm:$0xf] }
   0x4   :  { %v84_v13 = vsel %vm46_vm0, %v75_v3, 0.0  ;;  %v77_v16 = vcombine.high %v595_v8, %v595_v8  ;;  %v89_v19 = vsel %vm46_vm0, %v76_v9, 0.0  ;;  %v628_v22 = vld [vmem:[%s706_s0 + $0x18] sm:$0xff]  ;;  %v632_v23 = vcombine.high %v608_v12, %v608_v12  ;;  %v107_v42 = vld [vmem:[%s708_s2] sm:$0xf]  ;;  %492 = vmatpush3.msk.msra.mxu0 %vm46_vm0, %v108_v41 }
   0x5   :  { %v48_v14 = vsel %vm46_vm0, %v583_v5, 0.0  ;;  %v85_v17 = vadd.f32 %v84_v13, %v83_v4  ;;  %v53_v20 = vsel %vm46_vm0, %v603_v11, 0.0  ;;  %v90_v24 = vadd.f32 %v89_v19, %v88_v10  ;;  %497 = vmatpush3.msk.msra.mxu1 %vm46_vm0, %v107_v42  ;;  %501 = vmatprep.subr.mxu0 %v520_v40 }
   0x6   :  { %v49_v18 = vadd.f32 %v48_v14, %v47_v6  ;;  %v54_v25 = vadd.f32 %v53_v20, %v52_v15  ;;  %v93_v26 = vsel %vm46_vm0, %v595_v8, 0.0  ;;  %v94_v27 = vsel %vm46_vm0, %v77_v16, 0.0 }
   0x7   :  { %86 = vadd.xlane.f32.xlu1 %v85_v17  ;;  %v57_v28 = vsel %vm46_vm0, %v608_v12, 0.0  ;;  %v58_v29 = vsel %vm46_vm0, %v632_v23, 0.0  ;;  %v78_v30 = vcombine.high %v623_v21, %v623_v21  ;;  %v645_v31 = vcombine.high %v628_v22, %v628_v22 }
   0x8   :  { %50 = vadd.xlane.f32.xlu0 %v49_v18  ;;  %v95_v32 = vadd.f32 %v94_v27, %v93_v26  ;;  %v59_v33 = vadd.f32 %v58_v29, %v57_v28  ;;  %v98_v34 = vsel %vm46_vm0, %v623_v21, 0.0  ;;  %v62_v36 = vsel %vm46_vm0, %v628_v22, 0.0  ;;  %v480_v27 = vld [vmem:[%s710_s4] ss:$0 sm:$0xff] }
   0x9   :  { %v99_v35 = vsel %vm46_vm0, %v78_v30, 0.0  ;;  %v63_v37 = vsel %vm46_vm0, %v645_v31, 0.0  ;;  %v114_v46 = vand.u32 127, %v113_v43  ;;  %v664_v47 = vshrl.u32 %v113_v43, 7 }
   0xa   :  { %v100_v38 = vadd.f32 %v99_v35, %v98_v34  ;;  %v64_v39 = vadd.f32 %v63_v37, %v62_v36  ;;  %vm137_vm5 = vcmask 31744   ;;  %vm332_vm6 = vcmask 1041408   ;;  %v481_v34 = vld [vmem:[%s711_s6] ss:$0 sm:$0xff] }
   0xb   :  { %91 = vadd.xlane.f32.xlu1 %v90_v24  ;;  %v117_v52 = vsub.s32 %v114_v46, %v664_v47  ;;  %v320_v24 = vld [vmem:[%s709_s5] sm:$0x3]  ;;  %vm328_vm7 = vcmask 15360   ;;  %v421_v41 = vsub.s32 1, %v664_v47  ;;  %v414_v42 = vsub.s32 0, %v664_v47 }
   0xc   :  { %55 = vadd.xlane.f32.xlu0 %v54_v25  ;;  %v428_v46 = vsub.s32 2, %v664_v47 }
   0xf   :  { %96 = vadd.xlane.f32.xlu1 %v95_v32 }
  0x10   :  { %60 = vadd.xlane.f32.xlu0 %v59_v33 }
  0x13   :  { %101 = vadd.xlane.f32.xlu1 %v100_v38 }
  0x14   :  { %65 = vadd.xlane.f32.xlu0 %v64_v39 }
  0x94   :  { %v87_v44 = vpop.xlane.xlu1 %86 }
  0x95   :  { %v51_v45 = vpop.xlane.xlu0 %50  ;;  %v103_v55 = vmul.f32 0.00390625, %v87_v44 }
  0x96   :  { %v67_v56 = vmul.f32 0.00390625, %v51_v45 }
  0x97   :  { %v118_v4 = vrot.slane %v103_v55, %v117_v52 }
  0x98   :  { %v92_v48 = vpop.xlane.xlu1 %91  ;;  %v220_v6 = vrot.slane %v67_v56, %v117_v52 }
  0x99   :  { %v56_v49 = vpop.xlane.xlu0 %55  ;;  %v104_v50 = vmul.f32 0.00390625, %v92_v48 }
  0x9a   :  { %v68_v51 = vmul.f32 0.00390625, %v56_v49  ;;  %v435_v49 = vsub.s32 3, %v664_v47 }
  0x9b   :  { %v122_v59 = vrot.slane %v104_v50, %v117_v52 }
  0x9c   :  { %v97_v53 = vpop.xlane.xlu1 %96  ;;  %v224_v60 = vrot.slane %v68_v51, %v117_v52 }
  0x9d   :  { %v61_v54 = vpop.xlane.xlu0 %60  ;;  %v105_v57 = vmul.f32 0.00390625, %v97_v53  ;;  %v132_v13 = vsel %vm131_vm2, %v122_v59, %v118_v4 }
  0x9e   :  { %v69_v58 = vmul.f32 0.00390625, %v61_v54  ;;  %v233_v14 = vsel %vm131_vm2, %v224_v60, %v220_v6 }
  0x9f   :  { %v126_v61 = vrot.slane %v105_v57, %v117_v52 }
  0xa0   :  { %v228_v62 = vrot.slane %v69_v58, %v117_v52  ;;  %v102_v63 = vpop.xlane.xlu1 %101 }
  0xa1   :  { %v66_v3 = vpop.xlane.xlu0 %65  ;;  %v106_v9 = vmul.f32 0.00390625, %v102_v63  ;;  %v134_v17 = vsel %vm133_vm3, %v126_v61, %v132_v13 }
  0xa2   :  { %v70_v10 = vmul.f32 0.00390625, %v66_v3  ;;  %v234_v18 = vsel %vm133_vm3, %v228_v62, %v233_v14 }
  0xa3   :  { %v130_v15 = vrot.slane %v106_v9, %v117_v52 }
  0xa4   :  { %v232_v16 = vrot.slane %v70_v10, %v117_v52 }
  0xa5   :  { %v136_v19 = vsel %vm135_vm4, %v130_v15, %v134_v17 }
  0xa6   :  { %v235_v20 = vsel %vm135_vm4, %v232_v16, %v234_v18  ;;  %494 = vmatmul.mubr.msk.f32.vlgmr.msra.gmra.mrb[0].mxu0 %vm137_vm5, %v136_v19 }
  0xa7   :  { %499 = vmatmul.mubr.msk.f32.vlgmr.msra.gmra.mrb[0].mxu1 %vm137_vm5, %v235_v20  ;;  %503 = vmatprep.mubr.msk.f32.mxu0 %vm521_vm1, %v520_v40 }
  0xa8   :  { %502 = vmatpush3.msk.msra.mxu0 %vm332_vm6, %v320_v24 }
 0x179   :  { %v209_v25 = vpop.f32.mrb[0].mxu0 }
 0x17a   :  { %v307_v26 = vpop.f32.mrb[0].mxu1  ;;  %v495_v29 = vpop.f32.mrb[1].mxu0 }
 0x17b   :  { %v308_v28 = vadd.f32 %v307_v26, %v209_v25  ;;  %v500_v30 = vpop.f32.mrb[1].mxu1 }
 0x17d   :  { %v318_v32 = vadd.f32 %v480_v27, %v308_v28 }
 0x17f   :  { %v319_v33 = vmax.f32 %v318_v32, 0.0 }
 0x181   :  { %504 = vmatmul.mubr.msk.f32.vlgmr.msra.gmra.mrb[2].mxu0 %vm328_vm7, %v319_v33 }
 0x254   :  { %v402_v35 = vpop.f32.mrb[2].mxu0 }
 0x255   :  { %v403_v36 = vadd.f32 %v481_v34, %v402_v35  ;;  %v505_v37 = vpop.f32.mrb[3].mxu0 }
 0x257   :  { %v484_v38 = vmul.f32 -1.442695, %v403_v36 }
 0x259   :  { %516 = vpow2.f32 %v484_v38 }
 0x263   :  { %v517_v39 = vpop.eup %516 }
 0x264   :  { %v409_v40 = vadd.f32 1.0, %v517_v39 }
 0x266   :  { %518 = vrcp.f32 %v409_v40 }
 0x270   :  { %v519_v43 = vpop.eup %518 }
 0x271   :  { %v422_v44 = vrot.slane %v519_v43, %v421_v41  ;;  %v415_v45 = vrot.slane %v519_v43, %v414_v42  ;;  %v429_v48 = vrot.slane %v519_v43, %v428_v46  ;;  %v436_v50 = vrot.slane %v519_v43, %v435_v49 }
 0x273   :  { %424 = vbcast.lane.b32.xlu1 %v422_v44, 256  ;;  %417 = vbcast.lane.b32.xlu0 %v415_v45, 256 }
 0x277   :  { %431 = vbcast.lane.b32.xlu1 %v429_v48, 256 }
 0x27b   :  { %438 = vbcast.lane.b32.xlu1 %v436_v50, 256 }
 0x2e5   :  { %v425_v51 = vpop.permute.xlu1 %424  ;;  %v418_v52 = vpop.permute.xlu0 %417 }
 0x2e6   :  { %v442_v53 = vmul.f32 %v425_v51, %v590_v7  ;;  %v443_v54 = vmul.f32 %v425_v51, %v603_v11  ;;  %v440_v55 = vmul.f32 %v418_v52, %v570_v1  ;;  %v441_v56 = vmul.f32 %v418_v52, %v583_v5 }
 0x2e8   :  { %v457_v57 = vcombine.low %v442_v53, %v443_v54  ;;  %v456_v58 = vcombine.low %v440_v55, %v441_v56 }
 0x2e9   :  { %v432_v59 = vpop.permute.xlu1 %431 }
 0x2ea   :  { %v465_v60 = vadd.f32 %v457_v57, %v575_v2  ;;  %v464_v47 = vadd.f32 %v456_v58, %v565_v0  ;;  %v444_v61 = vmul.f32 %v432_v59, %v608_v12  ;;  %v445_v62 = vmul.f32 %v432_v59, %v632_v23 }
 0x2ec   :  { %469 = vst [vmem:[%s712_s7 + $0x8] sm:$0xff] %v465_v60  ;;  %468 = vst [vmem:[%s712_s7] sm:$0xff] %v464_v47  ;;  %v458_v1 = vcombine.low %v444_v61, %v445_v62 }
 0x2ed   :  { %v439_v5 = vpop.permute.xlu1 %438 }
 0x2ee   :  { %v466_v7 = vadd.f32 %v458_v1, %v595_v8  ;;  %v446_v2 = vmul.f32 %v439_v5, %v628_v22  ;;  %v447_v0 = vmul.f32 %v439_v5, %v645_v31 }
 0x2f0   :  { %470 = vst [vmem:[%s712_s7 + $0x10] sm:$0xff] %v466_v7  ;;  %v459_v11 = vcombine.low %v446_v2, %v447_v0 }
 0x2f2   :  { %v467_v12 = vadd.f32 %v459_v11, %v623_v21 }
 0x2f4   :  { %471 = vst [vmem:[%s712_s7 + $0x18] sm:$0xff] %v467_v12 }

</bundles_post_ra>
